<compile_context>
chip_gen: v5e
topology: v5e:2x2
jax: 0.10.0
libtpu: 0.0.40
codegen_flags: <defaults>
</compile_context>

<pallas_src>
import functools

import jax
import jax.numpy as jnp
from jax.experimental import pallas as pl
from jax.experimental.pallas import tpu as pltpu

LANES = 128
TARGET_BLOCK_ROWS = 2048  # 2048 * 128 * 4 B = 1 MiB per input per buffer (f32)


def _dice_kernel(p_ref, t_ref, out_ref, acc_pt_ref, acc_den_ref, *, smooth):
    i = pl.program_id(0)

    @pl.when(i == 0)
    def _init():
        acc_pt_ref[...] = jnp.zeros_like(acc_pt_ref)
        acc_den_ref[...] = jnp.zeros_like(acc_den_ref)

    # Upcast in-kernel; HBM traffic stays in the native dtype.
    p = jax.nn.sigmoid(p_ref[...].astype(jnp.float32))
    t = t_ref[...].astype(jnp.float32)

    # Pure-VPU elementwise accumulation into VMEM; no per-step cross-lane
    # reductions, no vreg->SMEM scalar sync.
    acc_pt_ref[...] += p * t        # intersection partials
    acc_den_ref[...] += p + t       # fused denominator partials

    @pl.when(i == pl.num_programs(0) - 1)
    def _finalize():
        intersection = jnp.sum(acc_pt_ref[...])
        denom = jnp.sum(acc_den_ref[...]) + smooth
        dice = (2.0 * intersection + smooth) / denom
        out_ref[0, 0] = 1.0 - dice


def dice_loss(predictions, targets, smooth=1.0):
    """Pallas implementation of DiceLoss.forward (returns a scalar f32)."""
    p_flat = predictions.reshape(-1)   # keep native dtype in HBM
    t_flat = targets.reshape(-1)
    n = p_flat.shape[0]

    rows_needed = -(-n // LANES)
    block_rows = max(8, min(TARGET_BLOCK_ROWS, ((rows_needed + 7) // 8) * 8))
    block_elems = block_rows * LANES
    n_pad = -(-n // block_elems) * block_elems
    pad = n_pad - n
    if pad:
        # sigmoid(-1e9) == 0 exactly in f32, so padded predictions contribute
        # nothing to any sum; padded targets are zero.  No mask stream needed.
        p_flat = jnp.pad(p_flat, (0, pad), constant_values=-1e9)
        t_flat = jnp.pad(t_flat, (0, pad), constant_values=0)

    rows = n_pad // LANES
    p2 = p_flat.reshape(rows, LANES)
    t2 = t_flat.reshape(rows, LANES)

    grid = (rows // block_rows,)
    blk_spec = pl.BlockSpec((block_rows, LANES), lambda i: (i, 0))

    out = pl.pallas_call(
        functools.partial(_dice_kernel, smooth=float(smooth)),
        out_shape=jax.ShapeDtypeStruct((1, 1), jnp.float32),
        grid_spec=pltpu.PrefetchScalarGridSpec(
            num_scalar_prefetch=0,
            grid=grid,
            in_specs=[blk_spec, blk_spec],
            out_specs=pl.BlockSpec(memory_space=pltpu.SMEM),
            scratch_shapes=[
                pltpu.VMEM((block_rows, LANES), jnp.float32),  # sum(p*t) partials
                pltpu.VMEM((block_rows, LANES), jnp.float32),  # sum(p+t) partials
            ],
        ),
        compiler_params=pltpu.CompilerParams(
            dimension_semantics=("arbitrary",)),
    )(p2, t2)
    return out[0, 0]


def _dice_loss_ref(predictions, targets, smooth=1.0):
    p = jax.nn.sigmoid(predictions.astype(jnp.float32)).reshape(-1)
    t = targets.astype(jnp.float32).reshape(-1)
    inter = jnp.sum(p * t)
    dice = (2.0 * inter + smooth) / (jnp.sum(p) + jnp.sum(t) + smooth)
    return 1.0 - dice


if __name__ == "__main__":
    key = jax.random.PRNGKey(0)
    k1, k2 = jax.random.split(key)
    # NCHW logits and binary mask targets, small segmentation-like shapes.
    preds = jax.random.normal(k1, (2, 4, 16, 16), dtype=jnp.float32)
    targs = (jax.random.uniform(k2, (2, 4, 16, 16)) > 0.5).astype(jnp.float32)

    loss = jax.block_until_ready(dice_loss(preds, targs, smooth=1.0))
    ref = jax.block_until_ready(_dice_loss_ref(preds, targs, smooth=1.0))

    assert jnp.allclose(loss, ref, atol=1e-5, rtol=1e-5), (loss, ref)
    print("KERNEL_OK")
</pallas_src>

<mosaic_0001>
module attributes {stable_mosaic.version = 11 : i64} {
  func.func @_dice_kernel(%arg0: i32, %arg1: memref<16x128xf32, #tpu.memory_space<vmem>>, %arg2: memref<16x128xf32, #tpu.memory_space<vmem>>, %arg3: memref<1x1xf32, #tpu.memory_space<smem>>, %arg4: memref<16x128xf32, #tpu.memory_space<vmem>>, %arg5: memref<16x128xf32, #tpu.memory_space<vmem>>) attributes {dimension_semantics = [#tpu.dimension_semantics<arbitrary>], iteration_bounds = array<i64: 1>, scalar_prefetch = 0 : i64, scratch_operands = 2 : i64, tpu.core_type = #tpu.core_type<tc>, window_params = [{transform_indices = @transform_0, window_bounds = array<i64: 16, 128>}, {transform_indices = @transform_1, window_bounds = array<i64: 16, 128>}, {transform_indices = @transform_2, window_bounds = array<i64: 1, 1>}]} {
    %c0_i32 = arith.constant 0 : i32
    %0 = arith.cmpi eq, %arg0, %c0_i32 : i32
    %1 = arith.extui %0 : i1 to i32
    %c0_i32_0 = arith.constant 0 : i32
    %2 = arith.cmpi ne, %1, %c0_i32_0 : i32
    scf.if %2 {
      %cst_14 = arith.constant 0.000000e+00 : f32
      %21 = vector.broadcast %cst_14 : f32 to vector<16x128xf32>
      %c0_15 = arith.constant 0 : index
      %c0_16 = arith.constant 0 : index
      %22 = vector.load %arg4[%c0_15, %c0_16] : memref<16x128xf32, #tpu.memory_space<vmem>>, vector<16x128xf32>
      tpu.vector_store %arg4[%c0_15, %c0_16], %21 {strides = array<i32>} : memref<16x128xf32, #tpu.memory_space<vmem>>, vector<16x128xf32>,
      %cst_17 = arith.constant 0.000000e+00 : f32
      %23 = vector.broadcast %cst_17 : f32 to vector<16x128xf32>
      %c0_18 = arith.constant 0 : index
      %c0_19 = arith.constant 0 : index
      %24 = vector.load %arg5[%c0_18, %c0_19] : memref<16x128xf32, #tpu.memory_space<vmem>>, vector<16x128xf32>
      tpu.vector_store %arg5[%c0_18, %c0_19], %23 {strides = array<i32>} : memref<16x128xf32, #tpu.memory_space<vmem>>, vector<16x128xf32>,
    } else {
    }
    %c0 = arith.constant 0 : index
    %c0_1 = arith.constant 0 : index
    %3 = vector.load %arg1[%c0, %c0_1] : memref<16x128xf32, #tpu.memory_space<vmem>>, vector<16x128xf32>
    %4 = arith.negf %3 : vector<16x128xf32>
    %5 = math.exp %4 : vector<16x128xf32>
    %cst = arith.constant 1.000000e+00 : f32
    %6 = vector.broadcast %cst : f32 to vector<16x128xf32>
    %7 = arith.addf %6, %5 : vector<16x128xf32>
    %8 = arith.divf %6, %7 : vector<16x128xf32>
    %c0_2 = arith.constant 0 : index
    %c0_3 = arith.constant 0 : index
    %9 = vector.load %arg2[%c0_2, %c0_3] : memref<16x128xf32, #tpu.memory_space<vmem>>, vector<16x128xf32>
    %c0_4 = arith.constant 0 : index
    %c0_5 = arith.constant 0 : index
    %10 = vector.load %arg4[%c0_4, %c0_5] : memref<16x128xf32, #tpu.memory_space<vmem>>, vector<16x128xf32>
    %11 = arith.mulf %8, %9 : vector<16x128xf32>
    %12 = arith.addf %10, %11 : vector<16x128xf32>
    %c0_6 = arith.constant 0 : index
    %c0_7 = arith.constant 0 : index
    %13 = vector.load %arg4[%c0_6, %c0_7] : memref<16x128xf32, #tpu.memory_space<vmem>>, vector<16x128xf32>
    tpu.vector_store %arg4[%c0_6, %c0_7], %12 {strides = array<i32>} : memref<16x128xf32, #tpu.memory_space<vmem>>, vector<16x128xf32>,
    %c0_8 = arith.constant 0 : index
    %c0_9 = arith.constant 0 : index
    %14 = vector.load %arg5[%c0_8, %c0_9] : memref<16x128xf32, #tpu.memory_space<vmem>>, vector<16x128xf32>
    %15 = arith.addf %8, %9 : vector<16x128xf32>
    %16 = arith.addf %14, %15 : vector<16x128xf32>
    %c0_10 = arith.constant 0 : index
    %c0_11 = arith.constant 0 : index
    %17 = vector.load %arg5[%c0_10, %c0_11] : memref<16x128xf32, #tpu.memory_space<vmem>>, vector<16x128xf32>
    tpu.vector_store %arg5[%c0_10, %c0_11], %16 {strides = array<i32>} : memref<16x128xf32, #tpu.memory_space<vmem>>, vector<16x128xf32>,
    %c0_i32_12 = arith.constant 0 : i32
    %18 = arith.cmpi eq, %arg0, %c0_i32_12 : i32
    %19 = arith.extui %18 : i1 to i32
    %c0_i32_13 = arith.constant 0 : i32
    %20 = arith.cmpi ne, %19, %c0_i32_13 : i32
    scf.if %20 {
      %c0_14 = arith.constant 0 : index
      %c0_15 = arith.constant 0 : index
      %21 = vector.load %arg4[%c0_14, %c0_15] : memref<16x128xf32, #tpu.memory_space<vmem>>, vector<16x128xf32>
      %22 = vector.shape_cast %21 : vector<16x128xf32> to vector<1x16x128xf32>
      %cst_16 = arith.constant dense<0.000000e+00> : vector<1xf32>
      %23 = vector.multi_reduction <add>, %22, %cst_16 [1, 2] : vector<1x16x128xf32> to vector<1xf32>
      %24 = vector.shape_cast %23 : vector<1xf32> to vector<1x1x1xf32>
      %25 = vector.extract %24[0, 0, 0] : f32 from vector<1x1x1xf32>
      %c0_17 = arith.constant 0 : index
      %c0_18 = arith.constant 0 : index
      %26 = vector.load %arg5[%c0_17, %c0_18] : memref<16x128xf32, #tpu.memory_space<vmem>>, vector<16x128xf32>
      %27 = vector.shape_cast %26 : vector<16x128xf32> to vector<1x16x128xf32>
      %cst_19 = arith.constant dense<0.000000e+00> : vector<1xf32>
      %28 = vector.multi_reduction <add>, %27, %cst_19 [1, 2] : vector<1x16x128xf32> to vector<1xf32>
      %29 = vector.shape_cast %28 : vector<1xf32> to vector<1x1x1xf32>
      %30 = vector.extract %29[0, 0, 0] : f32 from vector<1x1x1xf32>
      %cst_20 = arith.constant 1.000000e+00 : f32
      %31 = arith.addf %30, %cst_20 : f32
      %cst_21 = arith.constant 2.000000e+00 : f32
      %32 = arith.mulf %cst_21, %25 : f32
      %cst_22 = arith.constant 1.000000e+00 : f32
      %33 = arith.addf %32, %cst_22 : f32
      %34 = arith.divf %33, %31 : f32
      %cst_23 = arith.constant 1.000000e+00 : f32
      %35 = arith.subf %cst_23, %34 : f32
      %c0_24 = arith.constant 0 : index
      %c0_25 = arith.constant 0 : index
      %36 = memref.load %arg3[%c0_24, %c0_25] : memref<1x1xf32, #tpu.memory_space<smem>>
      memref.store %35, %arg3[%c0_24, %c0_25] : memref<1x1xf32, #tpu.memory_space<smem>>
    } else {
    }
    return
  }
  func.func @transform_0(%arg0: i32) -> (i32, i32) {
    %c0_i32 = arith.constant 0 : i32
    %c0_i32_0 = arith.constant 0 : i32
    return %arg0, %c0_i32 : i32, i32
  }
  func.func @transform_1(%arg0: i32) -> (i32, i32) {
    %c0_i32 = arith.constant 0 : i32
    %c0_i32_0 = arith.constant 0 : i32
    return %arg0, %c0_i32 : i32, i32
  }
  func.func @transform_2(%arg0: i32) -> (i32, i32) {
    %c0_i32 = arith.constant 0 : i32
    %c0_i32_0 = arith.constant 0 : i32
    %c0_i32_1 = arith.constant 0 : i32
    return %c0_i32, %c0_i32_0 : i32, i32
  }
}

</mosaic_0001>

<bundles_post_ra>
// kernel: tpu_custom_call.1
= control target key start
LH: loop header
LB: loop body
LE: loop exit
PB: predicated region body
PF: predicated region fallthrough
CT: control target
= control target key end

     0   :  { %7 = vsyncpa [#allocation5], 0  ;;  %s295_s0 = inlined_call_operand.hbm [shape: f32[16,128], index: 0, kind: input, shape index: {}]   ;;  %s296_s1 = inlined_call_operand.hbm [shape: f32[16,128], index: 1, kind: input, shape index: {}]   ;;  %s297_s2 = inlined_call_operand.hbm [shape: f32[1,1], index: 2, kind: output, shape index: {}]  }
   0x1   :  { %8 = vsyncpa [#allocation8], 0 }
   0x2   :  { %9 = vsyncpa [#allocation6], 0  ;;  %s14_s11 = sshll.u32 %s295_s0, 4  ;;  %s266_s12 = smov [#allocation4]   ;;  %s15_s11 = int_to_ptr.hbm [resolvable:$true] %s14_s11 }
   0x3   :  { %s16_s13 = sshll.u32 %s266_s12, 4  ;;  %s27_s16 = sshll.u32 %s296_s1, 4  ;;  %s17_s13 = int_to_ptr.vmem [resolvable:$true] %s16_s13  ;;  %s28_s16 = int_to_ptr.hbm [resolvable:$true] %s27_s16 }
   0x4   :  { %s267_s17 = smov 128   ;;  %s268_s18 = smov 8  }
   0x5   :  { %22 = dma.hbm_to_vmem [thread:$0]  %s15_s11, 256, %s17_s13, [#allocation5], %s267_s17, %s267_s17, %s268_s18  }
   0x6   :  { %s269_s19 = smov [#allocation7]  }
   0x7   :  { %s29_s20 = sshll.u32 %s269_s19, 4  ;;  %s30_s20 = int_to_ptr.vmem [resolvable:$true] %s29_s20 }
   0x8   :  { %35 = dma.hbm_to_vmem [thread:$0]  %s28_s16, 256, %s30_s20, [#allocation8], %s267_s17, %s267_s17, %s268_s18  }
   0x9   :  { %260 = dma.done.wait [#allocation5], 256  }
   0xa   :  { %261 = vsyncadd [#allocation5], 4294967040 }
   0xb   :  { %262 = dma.done.wait [#allocation8], 256  }
   0xc   :  { %263 = vsyncadd [#allocation8], 4294967040  ;;  %v52_v0 = vld [vmem:[#allocation4] sm:$0xff]  ;;  %v53_v1 = vld [vmem:[#allocation4 + $0x8] sm:$0xff]  ;;  %s165_s26 = sshll.u32 %s297_s2, 4  ;;  %s270_s30 = smov [#allocation9]   ;;  %s166_s26 = int_to_ptr.hbm [resolvable:$true] %s165_s26 }
   0xd   :  { %v177_v2 = vmul.f32 -1.442695, %v52_v0  ;;  %v178_v3 = vmul.f32 -1.442695, %v53_v1  ;;  %v92_v24 = vld [vmem:[#allocation7] sm:$0xff]  ;;  %v93_v26 = vld [vmem:[#allocation7 + $0x8] sm:$0xff] }
   0xf   :  { %190 = vpow2.f32 %v177_v2 }
  0x10   :  { %192 = vpow2.f32 %v178_v3 }
  0x15   :  { %v191_v4 = vpop.eup %190 }
  0x16   :  { %v193_v5 = vpop.eup %192  ;;  %v60_v6 = vadd.f32 1.0, %v191_v4 }
  0x17   :  { %v61_v7 = vadd.f32 1.0, %v193_v5 }
  0x18   :  { %194 = vrcp.f32 %v60_v6  ;;  %vm67_vm0 = vweird.f32 %v60_v6  ;;  %v73_v11 = vand.u32 2147483648, %v60_v6  ;;  %v71_v14 = vand.u32 2147483647, %v60_v6 }
  0x19   :  { %196 = vrcp.f32 %v61_v7  ;;  %v88_v15 = vand.u32 2147483648, %v61_v7  ;;  %vm82_vm2 = vweird.f32 %v61_v7  ;;  %v86_v17 = vand.u32 2147483647, %v61_v7 }
  0x1a   :  { %v74_v19 = vor.u32 1.1754944e-38, %v73_v11  ;;  %vm72_vm5 = vcmp.eq.f32.partialorder %v71_v14, 8.507059e+37 }
  0x1b   :  { %v89_v22 = vor.u32 1.1754944e-38, %v88_v15  ;;  %vm87_vm7 = vcmp.eq.f32.partialorder %v86_v17, 8.507059e+37 }
  0x1e   :  { %v195_v8 = vpop.eup %194 }
  0x1f   :  { %v197_v9 = vpop.eup %196  ;;  %v63_v10 = vmul.f32 %v195_v8, %v60_v6  ;;  %vm68_vm1 = vweird.f32 %v195_v8 }
  0x20   :  { %v78_v12 = vmul.f32 %v197_v9, %v61_v7  ;;  %vm83_vm3 = vweird.f32 %v197_v9  ;;  %vm69_vm4 = vmor %vm67_vm0, %vm68_vm1 }
  0x21   :  { %v64_v13 = vsub.f32 1.0, %v63_v10  ;;  %vm84_vm6 = vmor %vm82_vm2, %vm83_vm3 }
  0x22   :  { %v79_v16 = vsub.f32 1.0, %v78_v12 }
  0x23   :  { %v65_v18 = vmul.f32 %v195_v8, %v64_v13 }
  0x24   :  { %v80_v20 = vmul.f32 %v197_v9, %v79_v16 }
  0x25   :  { %v66_v21 = vadd.f32 %v195_v8, %v65_v18 }
  0x26   :  { %v81_v23 = vadd.f32 %v197_v9, %v80_v20 }
  0x27   :  { %v70_v25 = vsel %vm69_vm4, %v195_v8, %v66_v21 }
  0x28   :  { %v75_v27 = vsel %vm72_vm5, %v74_v19, %v70_v25  ;;  %v85_v28 = vsel %vm84_vm6, %v197_v9, %v81_v23 }
  0x29   :  { %v90_v29 = vsel %vm87_vm7, %v89_v22, %v85_v28  ;;  %v96_v30 = vmul.f32 %v92_v24, %v75_v27  ;;  %v104_v33 = vadd.f32 %v92_v24, %v75_v27 }
  0x2a   :  { %v97_v31 = vmul.f32 %v93_v26, %v90_v29  ;;  %v105_v34 = vadd.f32 %v93_v26, %v90_v29 }
  0x2c   :  { %v115_v32 = vadd.f32 %v97_v31, %v96_v30  ;;  %v127_v35 = vadd.f32 %v105_v34, %v104_v33 }
  0x2e   :  { %116 = vadd.xlane.f32.xlu0 %v115_v32 }
  0x36   :  { %128 = vadd.xlane.f32.xlu0 %v127_v35 }
  0xa1   :  { %v117_v36 = vpop.xlane.xlu0 %116 }
  0xa2   :  { %v118_v37 = vrot.slane %v117_v36, 4 }
  0xa4   :  { %v119_v38 = vadd.f32 %v118_v37, %v117_v36 }
  0xa6   :  { %v120_v39 = vrot.slane %v119_v38, 2 }
  0xa8   :  { %v121_v40 = vadd.f32 %v120_v39, %v119_v38 }
  0xa9   :  { %v129_v41 = vpop.xlane.xlu0 %128 }
  0xaa   :  { %v130_v42 = vrot.slane %v129_v41, 4  ;;  %v122_v43 = vrot.slane %v121_v40, 1 }
  0xac   :  { %v131_v44 = vadd.f32 %v130_v42, %v129_v41  ;;  %v123_v45 = vadd.f32 %v122_v43, %v121_v40 }
  0xae   :  { %v132_v46 = vrot.slane %v131_v44, 2  ;;  %179 = vpush %v123_v45 }
  0xb0   :  { %v133_v47 = vadd.f32 %v132_v46, %v131_v44 }
  0xb2   :  { %v134_v48 = vrot.slane %v133_v47, 1 }
  0xb4   :  { %v135_v49 = vadd.f32 %v134_v48, %v133_v47 }
  0xb6   :  { %181 = vpush %v135_v49 }
  0xdf   :  { %s180_s0 = spop %179 }
  0xe0   :  { %s138_s22 = smul.f32 2.0, %s180_s0 }
  0xe2   :  { %s139_s23 = sadd.f32 1.0, %s138_s22 }
  0xe7   :  { %s182_s1 = spop %181 }
  0xe8   :  { %s137_s21 = sadd.f32 1.0, %s182_s1 }
  0xea   :  { %v140_v50 = vstv %s137_s21 }
  0xeb   :  { %198 = vrcp.f32 %v140_v50  ;;  %v152_v54 = vand.u32 2147483648, %v140_v50  ;;  %v150_v56 = vand.u32 2147483647, %v140_v50  ;;  %vm146_vm9 = vweird.f32 %v140_v50 }
  0xed   :  { %v153_v58 = vor.u32 1.1754944e-38, %v152_v54  ;;  %vm151_vm11 = vcmp.eq.f32.partialorder %v150_v56, 8.507059e+37 }
  0xf1   :  { %v199_v51 = vpop.eup %198 }
  0xf2   :  { %v142_v52 = vmul.f32 %v199_v51, %v140_v50  ;;  %vm147_vm8 = vweird.f32 %v199_v51 }
  0xf3   :  { %vm148_vm10 = vmor %vm146_vm9, %vm147_vm8 }
  0xf4   :  { %v143_v53 = vsub.f32 1.0, %v142_v52 }
  0xf6   :  { %v144_v55 = vmul.f32 %v199_v51, %v143_v53 }
  0xf8   :  { %v145_v57 = vadd.f32 %v199_v51, %v144_v55 }
  0xfa   :  { %v149_v59 = vsel %vm148_vm10, %v199_v51, %v145_v57 }
  0xfb   :  { %v154_v60 = vsel %vm151_vm11, %v153_v58, %v149_v59 }
  0xfc   :  { %183 = vpush %v154_v60 }
 0x12d   :  { %s184_s27 = spop %183 }
 0x12e   :  { %s156_s28 = smul.f32 %s184_s27, %s139_s23 }
 0x130   :  { %s157_s29 = ssub.f32 1.0, %s156_s28 }
 0x132   :  { %159 = sst [smem:[#allocation9]] %s157_s29 }
 0x133   :  { %168 = dma.smem_to_hbm %s270_s30, 16, %s166_s26, [#allocation6]  }
 0x134   :  { %264 = dma.done.wait [#allocation6], 16  }
 0x135   :  { %265 = vsyncadd [#allocation6], 4294967280 }
 0x136   :  { %173 = sfence }
 0x137   :  { %174 = vsyncpa [#allocation5], 1 }
 0x138   :  { %175 = vsyncpa [#allocation8], 1 }
 0x139   :  { %176 = vsyncpa [#allocation6], 1 }

</bundles_post_ra>
